<compile_context>
chip_gen: v6e
topology: v6e:2x2x1
jax: 0.10.0
libtpu: 0.0.40
codegen_flags: <defaults>
</compile_context>

<pallas_src>
import math

import jax
import jax.numpy as jnp
from jax.experimental import pallas as pl
from jax.experimental.pallas import tpu as pltpu

_BN_EPS = 1e-5
_LANE = 128


def _ceil_to(n, m):
    return ((n + m - 1) // m) * m


# ---------------- Fused Pallas kernel ----------------

def _make_fused_mlp_kernel(n_layers, batch_norm, matmul_dtype):
    """Whole-MLP kernel on VMEM-resident full-array blocks (empty grid).

    Ref order: (x_ref, [w_0, vec_0, w_1, vec_1, ...], o_ref).
      w_i   : (cin_pad, cout_pad), already in `matmul_dtype` (no in-kernel cast).
      vec_i : packed f32 per-feature vectors:
                hidden layer with BN -> (2, cout_pad) = [gamma; beta]
                otherwise            -> (1, cout_pad) = [bias]
    """
    matmul_dtype = jnp.dtype(matmul_dtype)
    f32 = jnp.dtype(jnp.float32)

    def kernel(*refs):
        x_ref, o_ref = refs[0], refs[-1]
        p = refs[1:-1]

        h = x_ref[...]
        if h.dtype != matmul_dtype:  # wrapper already casts; cheap safety no-op
            h = h.astype(matmul_dtype)

        for i in range(n_layers):
            w = p[2 * i][...]          # (cin_pad, cout_pad) in matmul dtype
            vec = p[2 * i + 1][...]    # packed f32 per-feature vectors

            # MXU matmul, f32 accumulation.
            y = jnp.dot(h, w, preferred_element_type=jnp.float32)

            last = i == n_layers - 1
            if not last and batch_norm:
                gamma, beta = vec[0:1], vec[1:2]
                # Training-mode BatchNorm1d (biased variance). The Linear bias is a
                # per-feature constant and cancels exactly under mean subtraction,
                # so it is never added.
                mean = jnp.mean(y, axis=0, keepdims=True)
                d = y - mean
                var = jnp.mean(d * d, axis=0, keepdims=True)
                scale = gamma * jax.lax.rsqrt(var + _BN_EPS)   # EUP rsqrt, (1, C)
                # Apply as 2 VALU ops/element + ReLU max.
                y = jnp.maximum(d * scale + beta, 0.0)
            else:
                y = y + vec[0:1]                               # bias
                if not last:
                    y = jnp.maximum(y, 0.0)                    # ReLU

            if last:
                o_ref[...] = y.astype(o_ref.dtype)
            else:
                h = y.astype(matmul_dtype) if matmul_dtype != f32 else y

    return kernel


# ---------------- Wrapper: padding, packing, pallas_call ----------------

def mlp_forward(params, x, batch_norm=True, matmul_dtype=jnp.float32):
    """Single fused pallas_call for the whole MLP forward pass.

    Lane-dense layout plumbing (feature-dim padding to 128, weight dtype cast,
    gamma/beta packing) happens here, outside the kernel.
    """
    matmul_dtype = jnp.dtype(matmul_dtype)
    n_layers = len(params)
    batch, c_in = x.shape
    c_out = params[-1]["w"].shape[1]

    # --- pad input features to a lane-dense width and cast to the matmul dtype ---
    cin_pad0 = _ceil_to(c_in, _LANE)
    x_p = x
    if cin_pad0 != c_in:
        x_p = jnp.pad(x_p, ((0, 0), (0, cin_pad0 - c_in)))
    x_p = x_p.astype(matmul_dtype)
    # Note: batch should ideally be a multiple of 8 (f32) / 16 (bf16) for sublane
    # packing; correctness does not require it with whole-array VMEM blocks.

    # --- pad / cast / pack parameters (all outside the kernel) ---
    flat = []
    prev_pad = cin_pad0
    last_pad = None
    for i, layer in enumerate(params):
        cin, cout = layer["w"].shape
        cin_pad = prev_pad
        cout_pad = _ceil_to(cout, _LANE)

        w = layer["w"].astype(matmul_dtype)
        w = jnp.pad(w, ((0, cin_pad - cin), (0, cout_pad - cout)))

        def _padv(v):
            return jnp.pad(v.astype(jnp.float32), ((0, 0), (0, cout_pad - cout)))

        is_hidden = i < n_layers - 1
        if is_hidden and batch_norm:
            # Bias cancels under training-mode BN -> pack only [gamma; beta].
            vec = jnp.concatenate([_padv(layer["gamma"]), _padv(layer["beta"])], axis=0)
        else:
            vec = _padv(layer["b"])

        flat += [w, vec]
        prev_pad = cout_pad
        last_pad = cout_pad

    # --- advisory cost estimate (padded shapes, actual stored dtypes) ---
    flops = 0
    transcendentals = 0
    prev_pad = cin_pad0
    for i, layer in enumerate(params):
        cout_pad = _ceil_to(layer["w"].shape[1], _LANE)
        flops += 2 * batch * prev_pad * cout_pad
        if i < n_layers - 1 and batch_norm:
            transcendentals += cout_pad  # one rsqrt per feature lane
        prev_pad = cout_pad
    bytes_accessed = int(
        x_p.size * x_p.dtype.itemsize
        + sum(a.size * a.dtype.itemsize for a in flat)
        + batch * last_pad * 4)

    vmem_spec = pl.BlockSpec(memory_space=pltpu.MemorySpace.VMEM)
    kernel = _make_fused_mlp_kernel(n_layers, batch_norm, matmul_dtype)

    out_padded = pl.pallas_call(
        kernel,
        out_shape=jax.ShapeDtypeStruct((batch, last_pad), jnp.float32),
        in_specs=[vmem_spec] * (1 + len(flat)),
        out_specs=vmem_spec,
        cost_estimate=pl.CostEstimate(flops=flops,
                                      transcendentals=transcendentals,
                                      bytes_accessed=bytes_accessed),
    )(x_p, *flat)

    return out_padded[:, :c_out]


# ---------------- Parameter setup (deterministic, PyTorch-style init) ----------------

def init_mlp_params(key, layer_sizes, batch_norm=True, weight_dtype=jnp.float32):
    """PyTorch-style uniform init; weights stored PRE-TRANSPOSED as (Cin, Cout).

    Set weight_dtype=jnp.bfloat16 to keep weights bf16 in HBM (MXU-native on all
    TPU generations); bias/gamma/beta stay f32 (applied on the VPU in f32).
    """
    params = []
    n_layers = len(layer_sizes) - 1
    for i in range(n_layers):
        fan_in, fan_out = layer_sizes[i], layer_sizes[i + 1]
        key, kw, kb = jax.random.split(key, 3)
        bound = 1.0 / math.sqrt(fan_in)
        w = jax.random.uniform(kw, (fan_in, fan_out), jnp.float32, -bound, bound)
        b = jax.random.uniform(kb, (1, fan_out), jnp.float32, -bound, bound)
        layer = {"w": w.astype(weight_dtype), "b": b}
        if i < n_layers - 1 and batch_norm:
            layer["gamma"] = jnp.ones((1, fan_out), jnp.float32)
            layer["beta"] = jnp.zeros((1, fan_out), jnp.float32)
        params.append(layer)
    return params


# ---------------- Pure-JAX reference (exact PyTorch semantics) ----------------

def mlp_reference(params, x, batch_norm=True, matmul_dtype=jnp.float32):
    matmul_dtype = jnp.dtype(matmul_dtype)
    n_layers = len(params)
    h = x.astype(jnp.float32)
    for i, layer in enumerate(params):
        y = jnp.dot(h.astype(matmul_dtype), layer["w"].astype(matmul_dtype),
                    preferred_element_type=jnp.float32) + layer["b"].astype(jnp.float32)
        if i < n_layers - 1:
            if batch_norm:
                mean = jnp.mean(y, axis=0, keepdims=True)
                var = jnp.mean((y - mean) ** 2, axis=0, keepdims=True)
                y = (y - mean) * jax.lax.rsqrt(var + _BN_EPS)
                y = y * layer["gamma"] + layer["beta"]
            y = jnp.maximum(y, 0.0)
        h = y
    return h


if __name__ == "__main__":
    layer_sizes = [16, 32, 32, 8]   # MLP(layer_sizes, batch_norm=True, dropout_rate=0.0)
    batch = 8                        # multiple of 8 -> full f32 sublane packing

    key = jax.random.PRNGKey(0)
    key, kx = jax.random.split(key)
    x = jax.random.normal(kx, (batch, layer_sizes[0]), jnp.float32)

    params = init_mlp_params(key, layer_sizes, batch_norm=True)

    # f32 matmul path -- tight check against the pure-JAX / PyTorch-semantics reference.
    out = jax.block_until_ready(mlp_forward(params, x, batch_norm=True))
    ref = mlp_reference(params, x, batch_norm=True)
    assert out.shape == (batch, layer_sizes[-1])
    assert jnp.allclose(out, ref, atol=1e-4, rtol=1e-4), "f32 mismatch vs. reference"

    # bf16 path: weights stored bf16 in HBM (cast outside the kernel), bf16 MXU operands,
    # f32 accumulation / BN / ReLU math. Compared against a matching bf16-matmul reference.
    params_bf16 = [{**layer, "w": layer["w"].astype(jnp.bfloat16)} for layer in params]
    out_bf16 = jax.block_until_ready(
        mlp_forward(params_bf16, x, batch_norm=True, matmul_dtype=jnp.bfloat16))
    ref_bf16 = mlp_reference(params_bf16, x, batch_norm=True, matmul_dtype=jnp.bfloat16)
    assert jnp.allclose(out_bf16, ref_bf16, atol=2e-2, rtol=2e-2), "bf16 mismatch"

    # batch_norm=False configuration (Linear -> ReLU -> ... -> Linear).
    params_nobn = init_mlp_params(jax.random.PRNGKey(1), layer_sizes, batch_norm=False)
    out_nobn = jax.block_until_ready(mlp_forward(params_nobn, x, batch_norm=False))
    ref_nobn = mlp_reference(params_nobn, x, batch_norm=False)
    assert jnp.allclose(out_nobn, ref_nobn, atol=1e-4, rtol=1e-4), "no-BN mismatch"

    print("KERNEL_OK")
</pallas_src>

<mosaic_0001>
module attributes {stable_mosaic.version = 11 : i64} {
  func.func @kernel(%arg0: memref<8x128xf32, #tpu.memory_space<vmem>>, %arg1: memref<128x128xf32, #tpu.memory_space<vmem>>, %arg2: memref<2x128xf32, #tpu.memory_space<vmem>>, %arg3: memref<128x128xf32, #tpu.memory_space<vmem>>, %arg4: memref<2x128xf32, #tpu.memory_space<vmem>>, %arg5: memref<128x128xf32, #tpu.memory_space<vmem>>, %arg6: memref<1x128xf32, #tpu.memory_space<vmem>>, %arg7: memref<8x128xf32, #tpu.memory_space<vmem>>) attributes {dimension_semantics = [], scalar_prefetch = 0 : i64, scratch_operands = 0 : i64, tpu.core_type = #tpu.core_type<tc>} {
    %c0 = arith.constant 0 : index
    %c0_0 = arith.constant 0 : index
    %0 = vector.load %arg0[%c0, %c0_0] : memref<8x128xf32, #tpu.memory_space<vmem>>, vector<8x128xf32>
    %c0_1 = arith.constant 0 : index
    %c0_2 = arith.constant 0 : index
    %1 = vector.load %arg1[%c0_1, %c0_2] : memref<128x128xf32, #tpu.memory_space<vmem>>, vector<128x128xf32>
    %c0_3 = arith.constant 0 : index
    %c0_4 = arith.constant 0 : index
    %2 = vector.load %arg2[%c0_3, %c0_4] : memref<2x128xf32, #tpu.memory_space<vmem>>, vector<2x128xf32>
    %cst = arith.constant dense<0.000000e+00> : vector<8x128xf32>
    %3 = tpu.matmul %0, %1, %cst {dimension_numbers = #tpu.dot_dimension_numbers<[1], [0], [0], [1], [0, 0, 1, 1], [], []>} : vector<8x128xf32>, vector<128x128xf32>, vector<8x128xf32> -> vector<8x128xf32>
    %4 = vector.extract_strided_slice %2 {offsets = [0, 0], sizes = [1, 128], strides = [1, 1]} : vector<2x128xf32> to vector<1x128xf32>
    %5 = vector.extract_strided_slice %2 {offsets = [1, 0], sizes = [1, 128], strides = [1, 1]} : vector<2x128xf32> to vector<1x128xf32>
    %cst_5 = arith.constant dense<0.000000e+00> : vector<128xf32>
    %6 = vector.multi_reduction <add>, %3, %cst_5 [0] : vector<8x128xf32> to vector<128xf32>
    %7 = vector.shape_cast %6 : vector<128xf32> to vector<1x128xf32>
    %cst_6 = arith.constant 8.000000e+00 : f32
    %8 = vector.broadcast %cst_6 : f32 to vector<1x128xf32>
    %9 = arith.divf %7, %8 : vector<1x128xf32>
    %10 = vector.broadcast %9 : vector<1x128xf32> to vector<8x128xf32>
    %11 = arith.subf %3, %10 : vector<8x128xf32>
    %12 = arith.mulf %11, %11 : vector<8x128xf32>
    %cst_7 = arith.constant dense<0.000000e+00> : vector<128xf32>
    %13 = vector.multi_reduction <add>, %12, %cst_7 [0] : vector<8x128xf32> to vector<128xf32>
    %14 = vector.shape_cast %13 : vector<128xf32> to vector<1x128xf32>
    %cst_8 = arith.constant 8.000000e+00 : f32
    %15 = vector.broadcast %cst_8 : f32 to vector<1x128xf32>
    %16 = arith.divf %14, %15 : vector<1x128xf32>
    %cst_9 = arith.constant 9.99999974E-6 : f32
    %17 = vector.broadcast %cst_9 : f32 to vector<1x128xf32>
    %18 = arith.addf %16, %17 : vector<1x128xf32>
    %19 = math.rsqrt %18 : vector<1x128xf32>
    %20 = arith.mulf %4, %19 : vector<1x128xf32>
    %21 = vector.broadcast %20 : vector<1x128xf32> to vector<8x128xf32>
    %22 = arith.mulf %11, %21 : vector<8x128xf32>
    %23 = vector.broadcast %5 : vector<1x128xf32> to vector<8x128xf32>
    %24 = arith.addf %22, %23 : vector<8x128xf32>
    %cst_10 = arith.constant 0.000000e+00 : f32
    %25 = vector.broadcast %cst_10 : f32 to vector<8x128xf32>
    %26 = arith.maximumf %24, %25 : vector<8x128xf32>
    %c0_11 = arith.constant 0 : index
    %c0_12 = arith.constant 0 : index
    %27 = vector.load %arg3[%c0_11, %c0_12] : memref<128x128xf32, #tpu.memory_space<vmem>>, vector<128x128xf32>
    %c0_13 = arith.constant 0 : index
    %c0_14 = arith.constant 0 : index
    %28 = vector.load %arg4[%c0_13, %c0_14] : memref<2x128xf32, #tpu.memory_space<vmem>>, vector<2x128xf32>
    %cst_15 = arith.constant dense<0.000000e+00> : vector<8x128xf32>
    %29 = tpu.matmul %26, %27, %cst_15 {dimension_numbers = #tpu.dot_dimension_numbers<[1], [0], [0], [1], [0, 0, 1, 1], [], []>} : vector<8x128xf32>, vector<128x128xf32>, vector<8x128xf32> -> vector<8x128xf32>
    %30 = vector.extract_strided_slice %28 {offsets = [0, 0], sizes = [1, 128], strides = [1, 1]} : vector<2x128xf32> to vector<1x128xf32>
    %31 = vector.extract_strided_slice %28 {offsets = [1, 0], sizes = [1, 128], strides = [1, 1]} : vector<2x128xf32> to vector<1x128xf32>
    %cst_16 = arith.constant dense<0.000000e+00> : vector<128xf32>
    %32 = vector.multi_reduction <add>, %29, %cst_16 [0] : vector<8x128xf32> to vector<128xf32>
    %33 = vector.shape_cast %32 : vector<128xf32> to vector<1x128xf32>
    %cst_17 = arith.constant 8.000000e+00 : f32
    %34 = vector.broadcast %cst_17 : f32 to vector<1x128xf32>
    %35 = arith.divf %33, %34 : vector<1x128xf32>
    %36 = vector.broadcast %35 : vector<1x128xf32> to vector<8x128xf32>
    %37 = arith.subf %29, %36 : vector<8x128xf32>
    %38 = arith.mulf %37, %37 : vector<8x128xf32>
    %cst_18 = arith.constant dense<0.000000e+00> : vector<128xf32>
    %39 = vector.multi_reduction <add>, %38, %cst_18 [0] : vector<8x128xf32> to vector<128xf32>
    %40 = vector.shape_cast %39 : vector<128xf32> to vector<1x128xf32>
    %cst_19 = arith.constant 8.000000e+00 : f32
    %41 = vector.broadcast %cst_19 : f32 to vector<1x128xf32>
    %42 = arith.divf %40, %41 : vector<1x128xf32>
    %cst_20 = arith.constant 9.99999974E-6 : f32
    %43 = vector.broadcast %cst_20 : f32 to vector<1x128xf32>
    %44 = arith.addf %42, %43 : vector<1x128xf32>
    %45 = math.rsqrt %44 : vector<1x128xf32>
    %46 = arith.mulf %30, %45 : vector<1x128xf32>
    %47 = vector.broadcast %46 : vector<1x128xf32> to vector<8x128xf32>
    %48 = arith.mulf %37, %47 : vector<8x128xf32>
    %49 = vector.broadcast %31 : vector<1x128xf32> to vector<8x128xf32>
    %50 = arith.addf %48, %49 : vector<8x128xf32>
    %cst_21 = arith.constant 0.000000e+00 : f32
    %51 = vector.broadcast %cst_21 : f32 to vector<8x128xf32>
    %52 = arith.maximumf %50, %51 : vector<8x128xf32>
    %c0_22 = arith.constant 0 : index
    %c0_23 = arith.constant 0 : index
    %53 = vector.load %arg5[%c0_22, %c0_23] : memref<128x128xf32, #tpu.memory_space<vmem>>, vector<128x128xf32>
    %c0_24 = arith.constant 0 : index
    %c0_25 = arith.constant 0 : index
    %54 = vector.load %arg6[%c0_24, %c0_25] : memref<1x128xf32, #tpu.memory_space<vmem>>, vector<1x128xf32>
    %cst_26 = arith.constant dense<0.000000e+00> : vector<8x128xf32>
    %55 = tpu.matmul %52, %53, %cst_26 {dimension_numbers = #tpu.dot_dimension_numbers<[1], [0], [0], [1], [0, 0, 1, 1], [], []>} : vector<8x128xf32>, vector<128x128xf32>, vector<8x128xf32> -> vector<8x128xf32>
    %56 = vector.broadcast %54 : vector<1x128xf32> to vector<8x128xf32>
    %57 = arith.addf %55, %56 : vector<8x128xf32>
    %c0_27 = arith.constant 0 : index
    %c0_28 = arith.constant 0 : index
    %58 = vector.load %arg7[%c0_27, %c0_28] : memref<8x128xf32, #tpu.memory_space<vmem>>, vector<8x128xf32>
    tpu.vector_store %arg7[%c0_27, %c0_28], %57 {strides = array<i32>} : memref<8x128xf32, #tpu.memory_space<vmem>>, vector<8x128xf32>,
    return
  }
}

</mosaic_0001>

<bundles_post_ra>
// kernel: tpu_custom_call.1
= control target key start
LH: loop header
LB: loop body
LE: loop exit
PB: predicated region body
PF: predicated region fallthrough
CT: control target
= control target key end

     0   :  { %12 = vsyncpa [#allocation3], 0  ;;  %s853_s0 = inlined_call_operand.hbm [shape: f32[8,128], index: 0, kind: input, shape index: {}]   ;;  %s854_s1 = inlined_call_operand.hbm [shape: f32[128,128], index: 1, kind: input, shape index: {}]   ;;  %s855_s2 = inlined_call_operand.vmem [shape: f32[2,128], index: 2, kind: input, shape index: {}]   ;;  %s856_s3 = inlined_call_operand.hbm [shape: f32[128,128], index: 3, kind: input, shape index: {}]   ;;  %s857_s4 = inlined_call_operand.vmem [shape: f32[2,128], index: 4, kind: input, shape index: {}]   ;;  %s858_s5 = inlined_call_operand.hbm [shape: f32[128,128], index: 5, kind: input, shape index: {}]   ;;  %s859_s6 = inlined_call_operand.vmem [shape: f32[1,128], index: 6, kind: input, shape index: {}]   ;;  %s860_s7 = inlined_call_operand.hbm [shape: f32[8,128], index: 7, kind: output, shape index: {}]  }
   0x1   :  { %13 = vsyncpa [#allocation6], 0 }
   0x2   :  { %14 = vsyncpa [#allocation9], 0 }
   0x3   :  { %15 = vsyncpa [#allocation4], 0  ;;  %s705_s24 = smov [#allocation5]  }
   0x4   :  { %s31_s25 = sshll.u32 %s705_s24, 4  ;;  %s32_s25 = int_to_ptr.vmem [resolvable:$true] %s31_s25 }
   0x5   :  { %s605_s26 = scalar_lea.vmem %s32_s25, 2048  ;;  %p610_p1 = scmp.lt.s32.totalorder %s32_s25, %s32_s25 }
   0x6   :  { %p606_p0 = scmp.ne.s32.totalorder %s32_s25, %s605_s26  ;;  %p611_p2 = scmp.lt.s32.totalorder %s605_s26, %s605_s26 }
   0x8   :  { %p612_p3 = por %p611_p2, %p610_p1 }
   0xa   :  { %p613_p4 = pnand %p612_p3, %p606_p0 }
   0xc   :  { %616 = shalt.err (!%p613_p4)
}
   0xd   :  { %s706_s27 = smov 128   ;;  %s707_s28 = smov 8  }
   0xe   :  { %37 = dma.hbm_to_vmem [thread:$0]  %s854_s1, 2048, %s32_s25, [#allocation6], %s706_s27, %s706_s27, %s707_s28  }
   0xf   :  { %s708_s8 = smov [#allocation2]   ;;  %s709_s10 = smov [#allocation7]  }
  0x10   :  { %s22_s9 = sshll.u32 %s708_s8, 4  ;;  %s45_s11 = sshll.u32 %s709_s10, 4  ;;  %s23_s9 = int_to_ptr.vmem [resolvable:$true] %s22_s9  ;;  %s46_s11 = int_to_ptr.vmem [resolvable:$true] %s45_s11 }
  0x11   :  { %s625_s12 = scalar_lea.vmem %s23_s9, 128  ;;  %p630_p6 = scmp.lt.s32.totalorder %s23_s9, %s23_s9 }
  0x12   :  { %p626_p5 = scmp.ne.s32.totalorder %s23_s9, %s625_s12  ;;  %p631_p7 = scmp.lt.s32.totalorder %s625_s12, %s625_s12 }
  0x14   :  { %p632_p8 = por %p631_p7, %p630_p6 }
  0x16   :  { %p633_p9 = pnand %p632_p8, %p626_p5 }
  0x18   :  { %636 = shalt.err (!%p633_p9)
}
  0x19   :  { %25 = dma.hbm_to_vmem [thread:$0]  %s853_s0, 128, %s23_s9, [#allocation3]  }
  0x1a   :  { %s645_s15 = scalar_lea.vmem %s46_s11, 2048  ;;  %p650_p11 = scmp.lt.s32.totalorder %s46_s11, %s46_s11 }
  0x1b   :  { %p646_p10 = scmp.ne.s32.totalorder %s46_s11, %s645_s15  ;;  %p651_p12 = scmp.lt.s32.totalorder %s645_s15, %s645_s15 }
  0x1d   :  { %p652_p13 = por %p651_p12, %p650_p11 }
  0x1f   :  { %p653_p0 = pnand %p652_p13, %p646_p10 }
  0x21   :  { %656 = shalt.err (!%p653_p0)
}
  0x22   :  { %51 = dma.hbm_to_vmem [thread:$0]  %s856_s3, 2048, %s46_s11, [#allocation6], %s706_s27, %s706_s27, %s707_s28  }
  0x23   :  { %s710_s17 = smov [#allocation8]  }
  0x24   :  { %s59_s18 = sshll.u32 %s710_s17, 4  ;;  %s60_s18 = int_to_ptr.vmem [resolvable:$true] %s59_s18 }
  0x25   :  { %s665_s19 = scalar_lea.vmem %s60_s18, 2048  ;;  %p670_p2 = scmp.lt.s32.totalorder %s60_s18, %s60_s18 }
  0x26   :  { %p666_p1 = scmp.ne.s32.totalorder %s60_s18, %s665_s19  ;;  %p671_p3 = scmp.lt.s32.totalorder %s665_s19, %s665_s19 }
  0x28   :  { %p672_p4 = por %p671_p3, %p670_p2 }
  0x2a   :  { %p673_p5 = pnand %p672_p4, %p666_p1 }
  0x2c   :  { %676 = shalt.err (!%p673_p5)
}
  0x2d   :  { %65 = dma.hbm_to_vmem [thread:$0]  %s858_s5, 2048, %s60_s18, [#allocation9], %s706_s27, %s706_s27, %s707_s28  }
  0x2e   :  { %697 = dma.done.wait [#allocation3], 128  }
  0x2f   :  { %698 = vsyncadd [#allocation3], 4294967168 }
  0x30   :  { %699 = dma.done.wait [#allocation6], 4096  }
  0x31   :  { %700 = vsyncadd [#allocation6], 4294963200 }
  0x32   :  { %701 = dma.done.wait [#allocation9], 2048  }
  0x33   :  { %702 = vsyncadd [#allocation9], 4294965248  ;;  %v711_v0 = vmov 0.0   ;;  %vm712_vm0 = vmmov 0   ;;  %v96_v1 = vld [vmem:[#allocation5 + $0x78] sm:$0xff]  ;;  %v95_v2 = vld [vmem:[#allocation5 + $0x70] sm:$0xff]  ;;  %v188_v53 = vlaneseq }
  0x34   :  { %479 = vmatprep.subr.mxu0 %v711_v0  ;;  %511 = vmatprep.mubr.msk.f32.mxu0 %vm712_vm0, %v711_v0  ;;  %v94_v3 = vld [vmem:[#allocation5 + $0x68] sm:$0xff]  ;;  %v93_v4 = vld [vmem:[#allocation5 + $0x60] sm:$0xff]  ;;  %v92_v5 = vld [vmem:[#allocation5 + $0x58] sm:$0xff]  ;;  %s713_s24 = smov [#allocation10]  }
  0x35   :  { %514 = vmatprep.subr.mxu1 %v711_v0  ;;  %546 = vmatprep.mubr.msk.f32.mxu1 %vm712_vm0, %v711_v0  ;;  %v91_v6 = vld [vmem:[#allocation5 + $0x50] sm:$0xff]  ;;  %v90_v7 = vld [vmem:[#allocation5 + $0x48] sm:$0xff]  ;;  %v89_v8 = vld [vmem:[#allocation5 + $0x40] sm:$0xff]  ;;  %v814_v54 = vshrl.u32 %v188_v53, 7  ;;  %s416_s25 = sshll.u32 %s713_s24, 4  ;;  %s417_s25 = int_to_ptr.vmem [resolvable:$true] %s416_s25 }
  0x36   :  { %480 = vmatpush3.msra.mxu0 %v96_v1  ;;  %v88_v9 = vld [vmem:[#allocation5 + $0x38] sm:$0xff]  ;;  %v87_v10 = vld [vmem:[#allocation5 + $0x30] sm:$0xff]  ;;  %v86_v11 = vld [vmem:[#allocation5 + $0x28] sm:$0xff]  ;;  %p682_p7 = scmp.lt.s32.totalorder %s417_s25, %s417_s25 }
  0x37   :  { %481 = vmatprep.subr.mxu0 %v711_v0  ;;  %v85_v12 = vld [vmem:[#allocation5 + $0x20] sm:$0xff]  ;;  %v84_v13 = vld [vmem:[#allocation5 + $0x18] sm:$0xff]  ;;  %v83_v14 = vld [vmem:[#allocation5 + $0x10] sm:$0xff]  ;;  %v190_v56 = vsub.s32 0, %v814_v54  ;;  %v195_v57 = vsub.s32 1, %v814_v54 }
  0x38   :  { %482 = vmatpush3.msra.mxu0 %v95_v2  ;;  %v82_v15 = vld [vmem:[#allocation5 + $0x8] sm:$0xff]  ;;  %v81_v16 = vld [vmem:[#allocation5] sm:$0xff]  ;;  %v80_v17 = vld [vmem:[#allocation2] sm:$0xff] }
  0x39   :  { %483 = vmatprep.subr.mxu0 %v711_v0  ;;  %v214_v18 = vld [vmem:[#allocation7 + $0x78] sm:$0xff]  ;;  %v213_v19 = vld [vmem:[#allocation7 + $0x70] sm:$0xff]  ;;  %v212_v20 = vld [vmem:[#allocation7 + $0x68] sm:$0xff] }
  0x3a   :  { %484 = vmatpush3.msra.mxu0 %v94_v3  ;;  %515 = vmatpush3.msra.mxu1 %v214_v18  ;;  %v211_v21 = vld [vmem:[#allocation7 + $0x60] sm:$0xff]  ;;  %v210_v22 = vld [vmem:[#allocation7 + $0x58] sm:$0xff]  ;;  %v209_v23 = vld [vmem:[#allocation7 + $0x50] sm:$0xff] }
  0x3b   :  { %485 = vmatprep.subr.mxu0 %v711_v0  ;;  %516 = vmatprep.subr.mxu1 %v711_v0  ;;  %v208_v24 = vld [vmem:[#allocation7 + $0x48] sm:$0xff]  ;;  %v207_v25 = vld [vmem:[#allocation7 + $0x40] sm:$0xff]  ;;  %v206_v26 = vld [vmem:[#allocation7 + $0x38] sm:$0xff] }
  0x3c   :  { %486 = vmatpush3.msra.mxu0 %v93_v4  ;;  %517 = vmatpush3.msra.mxu1 %v213_v19  ;;  %v205_v27 = vld [vmem:[#allocation7 + $0x30] sm:$0xff]  ;;  %v204_v28 = vld [vmem:[#allocation7 + $0x28] sm:$0xff]  ;;  %v203_v29 = vld [vmem:[#allocation7 + $0x20] sm:$0xff] }
  0x3d   :  { %487 = vmatprep.subr.mxu0 %v711_v0  ;;  %518 = vmatprep.subr.mxu1 %v711_v0  ;;  %v202_v30 = vld [vmem:[#allocation7 + $0x18] sm:$0xff]  ;;  %v201_v31 = vld [vmem:[#allocation7 + $0x10] sm:$0xff]  ;;  %v200_v32 = vld [vmem:[#allocation7 + $0x8] sm:$0xff] }
  0x3e   :  { %488 = vmatpush3.msra.mxu0 %v92_v5  ;;  %519 = vmatpush3.msra.mxu1 %v212_v20  ;;  %v199_v33 = vld [vmem:[#allocation7] sm:$0xff]  ;;  %v97_v55 = vld [vmem:[%s855_s2] sm:$0x3]  ;;  %v330_v3 = vld [vmem:[#allocation8 + $0x70] sm:$0xff] }
  0x3f   :  { %489 = vmatprep.subr.mxu0 %v711_v0  ;;  %520 = vmatprep.subr.mxu1 %v711_v0  ;;  %v196_v61 = vrot.slane %v97_v55, %v195_v57  ;;  %v331_v2 = vld [vmem:[#allocation8 + $0x78] sm:$0xff]  ;;  %v329_v4 = vld [vmem:[#allocation8 + $0x68] sm:$0xff]  ;;  %v328_v5 = vld [vmem:[#allocation8 + $0x60] sm:$0xff] }
  0x40   :  { %490 = vmatpush3.msra.mxu0 %v91_v6  ;;  %521 = vmatpush3.msra.mxu1 %v211_v21  ;;  %v327_v6 = vld [vmem:[#allocation8 + $0x58] sm:$0xff] }
  0x41   :  { %491 = vmatprep.subr.mxu0 %v711_v0  ;;  %522 = vmatprep.subr.mxu1 %v711_v0 }
  0x42   :  { %492 = vmatpush3.msra.mxu0 %v90_v7  ;;  %523 = vmatpush3.msra.mxu1 %v210_v22  ;;  %v326_v7 = vld [vmem:[#allocation8 + $0x50] sm:$0xff] }
  0x43   :  { %493 = vmatprep.subr.mxu0 %v711_v0  ;;  %524 = vmatprep.subr.mxu1 %v711_v0 }
  0x44   :  { %494 = vmatpush3.msra.mxu0 %v89_v8  ;;  %525 = vmatpush3.msra.mxu1 %v209_v23  ;;  %v325_v8 = vld [vmem:[#allocation8 + $0x48] sm:$0xff] }
  0x45   :  { %495 = vmatprep.subr.mxu0 %v711_v0  ;;  %526 = vmatprep.subr.mxu1 %v711_v0 }
  0x46   :  { %496 = vmatpush3.msra.mxu0 %v88_v9  ;;  %527 = vmatpush3.msra.mxu1 %v208_v24  ;;  %v324_v9 = vld [vmem:[#allocation8 + $0x40] sm:$0xff] }
  0x47   :  { %497 = vmatprep.subr.mxu0 %v711_v0  ;;  %528 = vmatprep.subr.mxu1 %v711_v0 }
  0x48   :  { %498 = vmatpush3.msra.mxu0 %v87_v10  ;;  %529 = vmatpush3.msra.mxu1 %v207_v25  ;;  %v323_v10 = vld [vmem:[#allocation8 + $0x38] sm:$0xff] }
  0x49   :  { %499 = vmatprep.subr.mxu0 %v711_v0  ;;  %530 = vmatprep.subr.mxu1 %v711_v0 }
  0x4a   :  { %500 = vmatpush3.msra.mxu0 %v86_v11  ;;  %531 = vmatpush3.msra.mxu1 %v206_v26  ;;  %v322_v11 = vld [vmem:[#allocation8 + $0x30] sm:$0xff] }
  0x4b   :  { %501 = vmatprep.subr.mxu0 %v711_v0  ;;  %532 = vmatprep.subr.mxu1 %v711_v0 }
  0x4c   :  { %502 = vmatpush3.msra.mxu0 %v85_v12  ;;  %533 = vmatpush3.msra.mxu1 %v205_v27  ;;  %v321_v12 = vld [vmem:[#allocation8 + $0x28] sm:$0xff] }
  0x4d   :  { %503 = vmatprep.subr.mxu0 %v711_v0  ;;  %534 = vmatprep.subr.mxu1 %v711_v0 }
  0x4e   :  { %504 = vmatpush3.msra.mxu0 %v84_v13  ;;  %535 = vmatpush3.msra.mxu1 %v204_v28  ;;  %v320_v13 = vld [vmem:[#allocation8 + $0x20] sm:$0xff] }
  0x4f   :  { %505 = vmatprep.subr.mxu0 %v711_v0  ;;  %536 = vmatprep.subr.mxu1 %v711_v0 }
  0x50   :  { %506 = vmatpush3.msra.mxu0 %v83_v14  ;;  %537 = vmatpush3.msra.mxu1 %v203_v29  ;;  %v319_v14 = vld [vmem:[#allocation8 + $0x18] sm:$0xff] }
  0x51   :  { %507 = vmatprep.subr.mxu0 %v711_v0  ;;  %538 = vmatprep.subr.mxu1 %v711_v0 }
  0x52   :  { %508 = vmatpush3.msra.mxu0 %v82_v15  ;;  %539 = vmatpush3.msra.mxu1 %v202_v30  ;;  %v318_v15 = vld [vmem:[#allocation8 + $0x10] sm:$0xff] }
  0x53   :  { %509 = vmatprep.subr.mxu0 %v711_v0  ;;  %540 = vmatprep.subr.mxu1 %v711_v0 }
  0x54   :  { %510 = vmatpush3.msra.mxu0 %v81_v16  ;;  %541 = vmatpush3.msra.mxu1 %v201_v31  ;;  %v317_v16 = vld [vmem:[#allocation8 + $0x8] sm:$0xff] }
  0x55   :  { %512 = vmatmul.mubr.f32.vlgmr.msra.gmra.mxu0 %v80_v17  ;;  %549 = vmatprep.subr.mxu0 %v711_v0  ;;  %v316_v17 = vld [vmem:[#allocation8] sm:$0xff] }
  0x56   :  { %581 = vmatprep.mubr.msk.f32.mxu0 %vm712_vm0, %v711_v0  ;;  %542 = vmatprep.subr.mxu1 %v711_v0 }
  0x57   :  { %543 = vmatpush3.msra.mxu1 %v200_v32  ;;  %550 = vmatpush3.msra.mxu0 %v331_v2 }
  0x58   :  { %544 = vmatprep.subr.mxu1 %v711_v0  ;;  %551 = vmatprep.subr.mxu0 %v711_v0 }
  0x59   :  { %545 = vmatpush3.msra.mxu1 %v199_v33  ;;  %552 = vmatpush3.msra.mxu0 %v330_v3 }
  0x5a   :  { %553 = vmatprep.subr.mxu0 %v711_v0 }
  0x5b   :  { %554 = vmatpush3.msra.mxu0 %v329_v4 }
  0x5c   :  { %555 = vmatprep.subr.mxu0 %v711_v0 }
  0x5d   :  { %556 = vmatpush3.msra.mxu0 %v328_v5 }
  0x5e   :  { %557 = vmatprep.subr.mxu0 %v711_v0 }
  0x5f   :  { %558 = vmatpush3.msra.mxu0 %v327_v6 }
  0x60   :  { %559 = vmatprep.subr.mxu0 %v711_v0 }
  0x61   :  { %560 = vmatpush3.msra.mxu0 %v326_v7 }
  0x62   :  { %561 = vmatprep.subr.mxu0 %v711_v0 }
  0x63   :  { %562 = vmatpush3.msra.mxu0 %v325_v8 }
  0x64   :  { %563 = vmatprep.subr.mxu0 %v711_v0 }
  0x65   :  { %564 = vmatpush3.msra.mxu0 %v324_v9 }
  0x66   :  { %565 = vmatprep.subr.mxu0 %v711_v0 }
  0x67   :  { %566 = vmatpush3.msra.mxu0 %v323_v10 }
  0x68   :  { %567 = vmatprep.subr.mxu0 %v711_v0 }
  0x69   :  { %568 = vmatpush3.msra.mxu0 %v322_v11 }
  0x6a   :  { %569 = vmatprep.subr.mxu0 %v711_v0 }
  0x6b   :  { %570 = vmatpush3.msra.mxu0 %v321_v12 }
  0x6c   :  { %571 = vmatprep.subr.mxu0 %v711_v0 }
  0x6d   :  { %572 = vmatpush3.msra.mxu0 %v320_v13 }
  0x6e   :  { %573 = vmatprep.subr.mxu0 %v711_v0 }
  0x6f   :  { %574 = vmatpush3.msra.mxu0 %v319_v14 }
  0x70   :  { %575 = vmatprep.subr.mxu0 %v711_v0 }
  0x71   :  { %576 = vmatpush3.msra.mxu0 %v318_v15 }
  0x72   :  { %577 = vmatprep.subr.mxu0 %v711_v0 }
  0x73   :  { %578 = vmatpush3.msra.mxu0 %v317_v16 }
  0x74   :  { %579 = vmatprep.subr.mxu0 %v711_v0 }
  0x75   :  { %580 = vmatpush3.msra.mxu0 %v316_v17 }
 0x115   :  { %v164_v34 = vpop.f32.mrf.mxu0 }
 0x116   :  { %v168_v35 = vrot.slane %v164_v34, 4 }
 0x117   :  { %v513_v36 = vpop.f32.mrf.mxu0 }
 0x118   :  { %v169_v37 = vadd.f32 %v168_v35, %v164_v34  ;;  %v215_v36 = vld [vmem:[%s857_s4] sm:$0x3]  ;;  %s677_s4 = scalar_lea.vmem %s417_s25, 128 }
 0x119   :  { %p678_p6 = scmp.ne.s32.totalorder %s417_s25, %s677_s4  ;;  %p683_p8 = scmp.lt.s32.totalorder %s677_s4, %s677_s4 }
 0x11a   :  { %v170_v38 = vrot.slane %v169_v37, 2 }
 0x11b   :  { %p684_p9 = por %p683_p8, %p682_p7 }
 0x11c   :  { %v171_v39 = vadd.f32 %v170_v38, %v169_v37 }
 0x11d   :  { %p685_p10 = pnand %p684_p9, %p678_p6 }
 0x11e   :  { %v172_v40 = vrot.slane %v171_v39, 1 }
 0x120   :  { %v173_v41 = vadd.f32 %v172_v40, %v171_v39  ;;  %v313_v40 = vrot.slane %v215_v36, %v195_v57 }
 0x122   :  { %v175_v42 = vmul.f32 0.125, %v173_v41 }
 0x124   :  { %v176_v43 = vsub.f32 %v164_v34, %v175_v42 }
 0x126   :  { %v177_v44 = vmul.f32 %v176_v43, %v176_v43 }
 0x128   :  { %v178_v45 = vrot.slane %v177_v44, 4 }
 0x12a   :  { %v179_v46 = vadd.f32 %v178_v45, %v177_v44  ;;  %v427_v44 = vld [vmem:[%s859_s6] ss:$0 sm:$0xff] }
 0x12c   :  { %v180_v47 = vrot.slane %v179_v46, 2 }
 0x12e   :  { %v181_v48 = vadd.f32 %v180_v47, %v179_v46 }
 0x130   :  { %v182_v49 = vrot.slane %v181_v48, 1 }
 0x132   :  { %v183_v50 = vadd.f32 %v182_v49, %v181_v48 }
 0x134   :  { %v184_v51 = vmul.f32 0.125, %v183_v50 }
 0x136   :  { %v185_v52 = vadd.f32 1e-05, %v184_v51 }
 0x138   :  { %593 = vrsqrt.f32 %v185_v52 }
 0x145   :  { %v594_v58 = vpop.eup %593 }
 0x146   :  { %v187_v59 = vmul.f32 %v594_v58, %v97_v55 }
 0x148   :  { %v191_v60 = vrot.slane %v187_v59, %v190_v56 }
 0x14a   :  { %v192_v62 = vmul.f32 %v191_v60, %v176_v43 }
 0x14c   :  { %v197_v63 = vadd.f32 %v196_v61, %v192_v62 }
 0x14e   :  { %v198_v1 = vmax.f32 %v197_v63, 0.0 }
 0x150   :  { %547 = vmatmul.mubr.f32.vlgmr.msra.gmra.mxu1 %v198_v1 }
 0x210   :  { %v282_v18 = vpop.f32.mrf.mxu1 }
 0x211   :  { %v286_v19 = vrot.slane %v282_v18, 4 }
 0x212   :  { %v548_v20 = vpop.f32.mrf.mxu1 }
 0x213   :  { %v287_v21 = vadd.f32 %v286_v19, %v282_v18 }
 0x215   :  { %v288_v22 = vrot.slane %v287_v21, 2 }
 0x217   :  { %v289_v23 = vadd.f32 %v288_v22, %v287_v21 }
 0x219   :  { %v290_v24 = vrot.slane %v289_v23, 1 }
 0x21b   :  { %v291_v25 = vadd.f32 %v290_v24, %v289_v23 }
 0x21d   :  { %v292_v26 = vmul.f32 0.125, %v291_v25 }
 0x21f   :  { %v293_v27 = vsub.f32 %v282_v18, %v292_v26 }
 0x221   :  { %v294_v28 = vmul.f32 %v293_v27, %v293_v27 }
 0x223   :  { %v295_v29 = vrot.slane %v294_v28, 4 }
 0x225   :  { %v296_v30 = vadd.f32 %v295_v29, %v294_v28 }
 0x227   :  { %v297_v31 = vrot.slane %v296_v30, 2 }
 0x229   :  { %v298_v32 = vadd.f32 %v297_v31, %v296_v30 }
 0x22b   :  { %v299_v33 = vrot.slane %v298_v32, 1 }
 0x22d   :  { %v300_v34 = vadd.f32 %v299_v33, %v298_v32 }
 0x22f   :  { %v301_v35 = vmul.f32 0.125, %v300_v34 }
 0x231   :  { %v302_v0 = vadd.f32 1e-05, %v301_v35 }
 0x233   :  { %595 = vrsqrt.f32 %v302_v0 }
 0x240   :  { %v596_v37 = vpop.eup %595 }
 0x241   :  { %v304_v38 = vmul.f32 %v596_v37, %v215_v36 }
 0x243   :  { %v308_v39 = vrot.slane %v304_v38, %v190_v56 }
 0x245   :  { %v309_v41 = vmul.f32 %v308_v39, %v293_v27 }
 0x247   :  { %v314_v42 = vadd.f32 %v313_v40, %v309_v41 }
 0x249   :  { %v315_v43 = vmax.f32 %v314_v42, 0.0 }
 0x24b   :  { %582 = vmatmul.mubr.f32.vlgmr.msra.gmra.mxu0 %v315_v43 }
 0x30b   :  { %v405_v45 = vpop.f32.mrf.mxu0 }
 0x30c   :  { %v406_v46 = vadd.f32 %v427_v44, %v405_v45 }
 0x30d   :  { %v583_v47 = vpop.f32.mrf.mxu0 }
 0x30e   :  { %409 = vst [vmem:[#allocation10] sm:$0xff] %v406_v46 }
 0x30f   :  { %688 = shalt.err (!%p685_p10)
}
 0x310   :  { %419 = dma.vmem_to_hbm [thread:$0]  %s417_s25, 128, %s860_s7, [#allocation4]  }
 0x311   :  { %703 = dma.done.wait [#allocation4], 128  }
 0x312   :  { %704 = vsyncadd [#allocation4], 4294967168 }
 0x313   :  { %423 = vsyncpa [#allocation3], 1 }
 0x314   :  { %424 = vsyncpa [#allocation6], 1 }
 0x315   :  { %425 = vsyncpa [#allocation9], 1 }
 0x316   :  { %426 = vsyncpa [#allocation4], 1 }

</bundles_post_ra>
